<compile_context>
chip_gen: v7x
topology: tpu7x:2x2x1
jax: 0.10.0
libtpu: 0.0.40
codegen_flags: <defaults>
</compile_context>

<pallas_src>
import jax
import jax.numpy as jnp
import numpy as np
from jax.experimental import pallas as pl
from jax.experimental.pallas import tpu as pltpu


def _round_up(x: int, m: int) -> int:
    return ((x + m - 1) // m) * m


def _device_kind() -> str:
    try:
        return jax.devices()[0].device_kind.lower()
    except Exception:
        return ""


def _vmem_budget_bytes() -> int:
    kind = _device_kind()
    if "v5" in kind or "v6" in kind:
        return 100 * 1024 * 1024   # 128 MiB physical VMEM parts
    return 48 * 1024 * 1024        # v7x (64 MiB physical) / unknown: conservative


def _default_tiles():
    kind = _device_kind()
    if "v5" in kind or "v6" in kind:
        return 256, 1024, 512      # tm, tn, tk (bf16, large VMEM parts)
    return 256, 512, 512           # v7x / unknown


# ----------------------------------------------------------------------------
# Kernel: grid (M tiles, N tiles, K tiles), K innermost ("arbitrary").
#   acc (f32 VMEM scratch) accumulates x_tile @ rt_tile over K.
#   Epilogue on the last K step adds the hoisted low-rank term low @ bt and
#   does the single lane-dense store of the output tile.
# ----------------------------------------------------------------------------
def svd_linear_kernel(x_ref, low_ref, bt_ref, rt_ref, o_ref, acc_ref):
    k = pl.program_id(2)
    nk = pl.num_programs(2)

    partial = jnp.dot(x_ref[...], rt_ref[...], preferred_element_type=jnp.float32)

    @pl.when(k == 0)
    def _():
        acc_ref[...] = partial          # first-iteration assignment (no zero-fill)

    @pl.when(k > 0)
    def _():
        acc_ref[...] += partial

    @pl.when(k == nk - 1)
    def _():
        y = acc_ref[...] + jnp.dot(low_ref[...], bt_ref[...],
                                   preferred_element_type=jnp.float32)
        o_ref[...] = y.astype(o_ref.dtype)


# ----------------------------------------------------------------------------
# Init-time preparation: SVD split + transpose + cast + pad, done ONCE.
# ----------------------------------------------------------------------------
def prepare_svd_linear(weight, rank, *, compute_dtype=jnp.bfloat16, tn=None, tk=None):
    """weight: (out_features, in_features). Returns a params dict holding the
    pre-transposed, pre-cast, pre-padded weights and the tiling plan."""
    out_features, in_features = weight.shape
    assert rank > 0

    # Matches SVDLinear.reset_parameters (weight.double() SVD, host-side, init only).
    w64 = np.asarray(weight, dtype=np.float64)
    u, s, vh = np.linalg.svd(w64, full_matrices=False)
    us = u[:, :rank] * s[:rank]          # (out, rank)  == b.weight
    vh_r = vh[:rank]                     # (rank, in)   == a.weight
    w_r = w64 - us @ vh_r                # (out, in)    == r.weight
    assert np.isfinite(us).all() and np.isfinite(vh_r).all()

    K, N, R = in_features, out_features, rank
    tm_def, tn_def, tk_def = _default_tiles()
    tn = tn or tn_def
    tk = tk or tk_def

    tk_e = min(tk, _round_up(K, 128))
    tn_e = min(tn, _round_up(N, 128))
    rp = _round_up(R, 128)               # lane-pad the tiny rank dimension
    Kp = _round_up(K, tk_e)
    Np = _round_up(N, tn_e)

    def pad2(a, s0, s1):
        return np.pad(a, ((0, s0 - a.shape[0]), (0, s1 - a.shape[1])))

    atp = jnp.asarray(pad2(vh_r.T, Kp, rp), dtype=compute_dtype)   # (Kp, rp)
    btp = jnp.asarray(pad2(us.T, rp, Np), dtype=compute_dtype)     # (rp, Np)
    rtp = jnp.asarray(pad2(w_r.T, Kp, Np), dtype=compute_dtype)    # (Kp, Np)

    return dict(atp=atp, btp=btp, rtp=rtp,
                K=K, N=N, R=R, Kp=Kp, Np=Np, rp=rp,
                tk=tk_e, tn=tn_e, tm=tm_def,
                compute_dtype=compute_dtype)


# ----------------------------------------------------------------------------
# Forward: only x-side work happens per call.
# ----------------------------------------------------------------------------
def svd_linear_forward(x, params, *, tm=None):
    M, K = x.shape
    assert K == params["K"], "input feature dim mismatch"
    out_dtype = x.dtype
    cdt = params["compute_dtype"]
    tk_e, tn_e, rp = params["tk"], params["tn"], params["rp"]
    Kp, Np, N = params["Kp"], params["Np"], params["N"]
    atp, btp, rtp = params["atp"], params["btp"], params["rtp"]

    tm = tm or params["tm"]
    tm_e = min(tm, _round_up(M, 8))
    Mp = _round_up(M, tm_e)

    xp = x.astype(cdt)
    if Mp != M or Kp != K:
        xp = jnp.pad(xp, ((0, Mp - M), (0, Kp - K)))

    # Low-rank projection hoisted out of the kernel (M*K*R FLOPs, negligible),
    # f32-accumulated, then cast to the MXU-native compute dtype.
    low = jnp.dot(xp, atp, preferred_element_type=jnp.float32).astype(cdt)  # (Mp, rp)

    grid = (Mp // tm_e, Np // tn_e, Kp // tk_e)
    n_i, n_j, _ = grid

    in_sz = jnp.dtype(cdt).itemsize
    out_sz = jnp.dtype(out_dtype).itemsize

    # Double-buffered input tiles + double-buffered output tile + f32 accumulator.
    vmem_bytes = (2 * in_sz * (tm_e * tk_e + tm_e * rp + rp * tn_e + tk_e * tn_e)
                  + 2 * out_sz * tm_e * tn_e
                  + 4 * tm_e * tn_e)
    vmem_limit = int(min(max(2 * vmem_bytes, 16 * 1024 * 1024), _vmem_budget_bytes()))

    # Truthful streamed-bytes estimate (rt re-read per M tile, x per N tile).
    cost = pl.CostEstimate(
        flops=2 * Mp * Kp * Np + 2 * Mp * rp * Np + 2 * Mp * Kp * rp,
        transcendentals=0,
        bytes_accessed=(in_sz * (n_j * Mp * Kp        # x, re-read per N tile
                                 + n_i * Kp * Np      # rt, re-read per M tile
                                 + n_i * rp * Np      # bt, re-read per M tile
                                 + Mp * rp)           # low, read once per M tile
                        + out_sz * Mp * Np),
    )

    out_padded = pl.pallas_call(
        svd_linear_kernel,
        out_shape=jax.ShapeDtypeStruct((Mp, Np), out_dtype),
        grid_spec=pltpu.PrefetchScalarGridSpec(
            num_scalar_prefetch=0,
            grid=grid,
            in_specs=[
                pl.BlockSpec((tm_e, tk_e), lambda i, j, k: (i, k)),   # x
                pl.BlockSpec((tm_e, rp),   lambda i, j, k: (i, 0)),   # low (resident per i)
                pl.BlockSpec((rp, tn_e),   lambda i, j, k: (0, j)),   # bt  (resident per j)
                pl.BlockSpec((tk_e, tn_e), lambda i, j, k: (k, j)),   # rt  (streamed)
            ],
            out_specs=pl.BlockSpec((tm_e, tn_e), lambda i, j, k: (i, j)),
            scratch_shapes=[pltpu.VMEM((tm_e, tn_e), jnp.float32)],
        ),
        compiler_params=pltpu.CompilerParams(
            dimension_semantics=("parallel", "parallel", "arbitrary"),
            vmem_limit_bytes=vmem_limit,
        ),
        cost_estimate=cost,
    )(xp, low, btp, rtp)

    return out_padded[:M, :N]


# ----------------------------------------------------------------------------
# Demo / correctness check
# ----------------------------------------------------------------------------
if __name__ == "__main__":
    batch, in_features, out_features, rank = 16, 256, 256, 8

    key = jax.random.PRNGKey(0)
    k_w, k_x = jax.random.split(key)
    weight = jax.random.normal(k_w, (out_features, in_features), jnp.float32) * 0.1
    x = jax.random.normal(k_x, (batch, in_features), jnp.float32)

    # Reference: same SVD split, y = b(a(x)) + r(x) in float64.
    w64 = np.asarray(weight, np.float64)
    u, s, vh = np.linalg.svd(w64, full_matrices=False)
    us = u[:, :rank] * s[:rank]
    vh_r = vh[:rank]
    w_r = w64 - us @ vh_r
    xn = np.asarray(x, np.float64)
    y_ref = (xn @ vh_r.T) @ us.T + xn @ w_r.T

    # 1) f32 compute path with small tiles -> exercises the full (M, N, K) grid,
    #    the resident K accumulator and the epilogue (tight tolerance).
    p32 = prepare_svd_linear(weight, rank, compute_dtype=jnp.float32, tn=128, tk=128)
    y32 = svd_linear_forward(x, p32, tm=8)
    jax.block_until_ready(y32)
    assert y32.shape == (batch, out_features)
    assert np.allclose(np.asarray(y32, np.float64), y_ref, atol=1e-4, rtol=1e-4)

    # 2) Default path: bf16 MXU-native compute, f32 accumulation, default tiles
    #    (single grid step at this small size).
    pbf = prepare_svd_linear(weight, rank)
    ybf = svd_linear_forward(x, pbf)
    jax.block_until_ready(ybf)
    assert ybf.shape == (batch, out_features)
    assert np.allclose(np.asarray(ybf, np.float64), y_ref, atol=1e-1, rtol=5e-2)

    print("KERNEL_OK")
</pallas_src>

<mosaic_0001>
module attributes {stable_mosaic.version = 11 : i64} {
  func.func @svd_linear_kernel(%arg0: i32, %arg1: i32, %arg2: i32, %arg3: memref<8x128xf32, #tpu.memory_space<vmem>>, %arg4: memref<8x128xf32, #tpu.memory_space<vmem>>, %arg5: memref<128x128xf32, #tpu.memory_space<vmem>>, %arg6: memref<128x128xf32, #tpu.memory_space<vmem>>, %arg7: memref<8x128xf32, #tpu.memory_space<vmem>>, %arg8: memref<8x128xf32, #tpu.memory_space<vmem>>) attributes {dimension_semantics = [#tpu.dimension_semantics<parallel>, #tpu.dimension_semantics<parallel>, #tpu.dimension_semantics<arbitrary>], iteration_bounds = array<i64: 2, 2, 2>, scalar_prefetch = 0 : i64, scratch_operands = 1 : i64, tpu.core_type = #tpu.core_type<tc>, window_params = [{transform_indices = @transform_0, window_bounds = array<i64: 8, 128>}, {transform_indices = @transform_1, window_bounds = array<i64: 8, 128>}, {transform_indices = @transform_2, window_bounds = array<i64: 128, 128>}, {transform_indices = @transform_3, window_bounds = array<i64: 128, 128>}, {transform_indices = @transform_4, window_bounds = array<i64: 8, 128>}]} {
    %c0 = arith.constant 0 : index
    %c0_0 = arith.constant 0 : index
    %0 = vector.load %arg3[%c0, %c0_0] : memref<8x128xf32, #tpu.memory_space<vmem>>, vector<8x128xf32>
    %c0_1 = arith.constant 0 : index
    %c0_2 = arith.constant 0 : index
    %1 = vector.load %arg6[%c0_1, %c0_2] : memref<128x128xf32, #tpu.memory_space<vmem>>, vector<128x128xf32>
    %cst = arith.constant dense<0.000000e+00> : vector<8x128xf32>
    %2 = tpu.matmul %0, %1, %cst {dimension_numbers = #tpu.dot_dimension_numbers<[1], [0], [0], [1], [0, 0, 1, 1], [], []>} : vector<8x128xf32>, vector<128x128xf32>, vector<8x128xf32> -> vector<8x128xf32>
    %c0_i32 = arith.constant 0 : i32
    %3 = arith.cmpi eq, %arg2, %c0_i32 : i32
    %4 = arith.extui %3 : i1 to i32
    %c0_i32_3 = arith.constant 0 : i32
    %5 = arith.cmpi ne, %4, %c0_i32_3 : i32
    scf.if %5 {
      %c0_7 = arith.constant 0 : index
      %c0_8 = arith.constant 0 : index
      %12 = vector.load %arg8[%c0_7, %c0_8] : memref<8x128xf32, #tpu.memory_space<vmem>>, vector<8x128xf32>
      tpu.vector_store %arg8[%c0_7, %c0_8], %2 {strides = array<i32>} : memref<8x128xf32, #tpu.memory_space<vmem>>, vector<8x128xf32>,
    } else {
    }
    %c0_i32_4 = arith.constant 0 : i32
    %6 = arith.cmpi sgt, %arg2, %c0_i32_4 : i32
    %7 = arith.extui %6 : i1 to i32
    %c0_i32_5 = arith.constant 0 : i32
    %8 = arith.cmpi ne, %7, %c0_i32_5 : i32
    scf.if %8 {
      %c0_7 = arith.constant 0 : index
      %c0_8 = arith.constant 0 : index
      %12 = vector.load %arg8[%c0_7, %c0_8] : memref<8x128xf32, #tpu.memory_space<vmem>>, vector<8x128xf32>
      %13 = arith.addf %12, %2 : vector<8x128xf32>
      %c0_9 = arith.constant 0 : index
      %c0_10 = arith.constant 0 : index
      %14 = vector.load %arg8[%c0_9, %c0_10] : memref<8x128xf32, #tpu.memory_space<vmem>>, vector<8x128xf32>
      tpu.vector_store %arg8[%c0_9, %c0_10], %13 {strides = array<i32>} : memref<8x128xf32, #tpu.memory_space<vmem>>, vector<8x128xf32>,
    } else {
    }
    %c1_i32 = arith.constant 1 : i32
    %9 = arith.cmpi eq, %arg2, %c1_i32 : i32
    %10 = arith.extui %9 : i1 to i32
    %c0_i32_6 = arith.constant 0 : i32
    %11 = arith.cmpi ne, %10, %c0_i32_6 : i32
    scf.if %11 {
      %c0_7 = arith.constant 0 : index
      %c0_8 = arith.constant 0 : index
      %12 = vector.load %arg8[%c0_7, %c0_8] : memref<8x128xf32, #tpu.memory_space<vmem>>, vector<8x128xf32>
      %c0_9 = arith.constant 0 : index
      %c0_10 = arith.constant 0 : index
      %13 = vector.load %arg4[%c0_9, %c0_10] : memref<8x128xf32, #tpu.memory_space<vmem>>, vector<8x128xf32>
      %c0_11 = arith.constant 0 : index
      %c0_12 = arith.constant 0 : index
      %14 = vector.load %arg5[%c0_11, %c0_12] : memref<128x128xf32, #tpu.memory_space<vmem>>, vector<128x128xf32>
      %cst_13 = arith.constant dense<0.000000e+00> : vector<8x128xf32>
      %15 = tpu.matmul %13, %14, %cst_13 {dimension_numbers = #tpu.dot_dimension_numbers<[1], [0], [0], [1], [0, 0, 1, 1], [], []>} : vector<8x128xf32>, vector<128x128xf32>, vector<8x128xf32> -> vector<8x128xf32>
      %16 = arith.addf %12, %15 : vector<8x128xf32>
      %c0_14 = arith.constant 0 : index
      %c0_15 = arith.constant 0 : index
      %17 = vector.load %arg7[%c0_14, %c0_15] : memref<8x128xf32, #tpu.memory_space<vmem>>, vector<8x128xf32>
      tpu.vector_store %arg7[%c0_14, %c0_15], %16 {strides = array<i32>} : memref<8x128xf32, #tpu.memory_space<vmem>>, vector<8x128xf32>,
    } else {
    }
    return
  }
  func.func @transform_0(%arg0: i32, %arg1: i32, %arg2: i32) -> (i32, i32) {
    %c0_i32 = arith.constant 0 : i32
    return %arg0, %arg2 : i32, i32
  }
  func.func @transform_1(%arg0: i32, %arg1: i32, %arg2: i32) -> (i32, i32) {
    %c0_i32 = arith.constant 0 : i32
    %c0_i32_0 = arith.constant 0 : i32
    return %arg0, %c0_i32 : i32, i32
  }
  func.func @transform_2(%arg0: i32, %arg1: i32, %arg2: i32) -> (i32, i32) {
    %c0_i32 = arith.constant 0 : i32
    %c0_i32_0 = arith.constant 0 : i32
    return %c0_i32, %arg1 : i32, i32
  }
  func.func @transform_3(%arg0: i32, %arg1: i32, %arg2: i32) -> (i32, i32) {
    %c0_i32 = arith.constant 0 : i32
    return %arg2, %arg1 : i32, i32
  }
  func.func @transform_4(%arg0: i32, %arg1: i32, %arg2: i32) -> (i32, i32) {
    %c0_i32 = arith.constant 0 : i32
    return %arg0, %arg1 : i32, i32
  }
}

</mosaic_0001>

<bundles_post_ra>
// kernel: tpu_custom_call.1
= control target key start
LH: loop header
LB: loop body
LE: loop exit
PB: predicated region body
PF: predicated region fallthrough
CT: control target
= control target key end

     0   :  { %s2111_s0 = inlined_call_operand.hbm [shape: f32[16,256], index: 0, kind: input, shape index: {}]   ;;  %s2112_s1 = inlined_call_operand.hbm [shape: f32[16,128], index: 1, kind: input, shape index: {}]   ;;  %s2113_s2 = inlined_call_operand.hbm [shape: f32[128,256], index: 2, kind: input, shape index: {}]   ;;  %s2114_s3 = inlined_call_operand.hbm [shape: f32[256,256], index: 3, kind: input, shape index: {}]   ;;  %s2115_s4 = inlined_call_operand.hbm [shape: f32[16,256], index: 4, kind: output, shape index: {}]  }
   0x1   :  { %2149 = sst [smem:[#allocation40_spill]] %s2111_s0 }
   0x2   :  { %2150 = sst [smem:[#allocation41_spill]] %s2112_s1 }
   0x3   :  { %2151 = sst [smem:[#allocation42_spill]] %s2113_s2 }
   0x4   :  { %2152 = sst [smem:[#allocation43_spill]] %s2114_s3 }
   0x5   :  { %2153 = sst [smem:[#allocation44_spill]] %s2115_s4 }
   0x6   :  { %9 = vsyncpa [#allocation4], 0 }
   0x7   :  { %11 = vsyncpa [#allocation4 + $0x1], 0 }
   0x8   :  { %12 = vsyncpa [#allocation7], 0 }
   0x9   :  { %14 = vsyncpa [#allocation7 + $0x1], 0 }
   0xa   :  { %15 = vsyncpa [#allocation10], 0 }
   0xb   :  { %17 = vsyncpa [#allocation10 + $0x1], 0 }
   0xc   :  { %18 = vsyncpa [#allocation5], 0 }
   0xd   :  { %20 = vsyncpa [#allocation5 + $0x1], 0  ;;  %s1503_s15 = smov 0   ;;  %s1505_s16 = smov 0  }
   0xe   :  { %s1507_s17 = smov 0   ;;  %s1509_s18 = smov 0  }
   0xf   :  { %s1511_s19 = smov 0   ;;  %s1513_s20 = smov 0  }
  0x10   :  { %s1515_s21 = smov 0   ;;  %s1517_s22 = smov 0  }
  0x11   :  { %s1519_s23 = smov 0   ;;  %s1521_s24 = smov 0  }
  0x12   :  { %s1523_s25 = smov 0   ;;  %s1525_s26 = smov 0  }
  0x13   :  { %s1527_s27 = smov 0   ;;  %s1529_s28 = smov 0  }
  0x14   :  { %s1531_s29 = smov 0   ;;  %s1533_s30 = smov 0  }
  0x15   :  { %s1535_s5 = smov 0   ;;  %s1537_s6 = smov 0  }
  0x16   :  { %s1539_s7 = smov 0   ;;  %s1541_s8 = smov 0  }
  0x17   :  { %s1543_s9 = smov 0   ;;  %s1545_s10 = smov 0  }
  0x18 LB: > { %2154 = sst [smem:[#allocation17_spill]] %s1378_s15  ;;  %s1612_s11 = sadd.s32 4294967295, %s1462_s10   ;;  %s1462_s10 = sphi %s1545_s10, %s26_s10   ;;  %s1458_s9 = sphi %s1543_s9, %s2257_s9   ;;  %s1454_s8 = sphi %s1541_s8, %s2270_s8   ;;  %s1450_s7 = sphi %s1539_s7, %s2269_s7   ;;  %s1446_s6 = sphi %s1537_s6, %s2268_s6   ;;  %s1442_s5 = sphi %s1535_s5, %s2267_s5   ;;  %s1438_s30 = sphi %s1533_s30, %s2266_s30   ;;  %s1434_s29 = sphi %s1531_s29, %s2251_s29   ;;  %s1430_s28 = sphi %s1529_s28, %s2250_s28   ;;  %s1426_s27 = sphi %s1527_s27, %s2265_s27   ;;  %s1422_s26 = sphi %s1525_s26, %s2264_s26   ;;  %s1418_s25 = sphi %s1523_s25, %s2263_s25   ;;  %s1414_s24 = sphi %s1521_s24, %s2247_s24   ;;  %s1410_s23 = sphi %s1519_s23, %s2262_s23   ;;  %s1406_s22 = sphi %s1517_s22, %s2261_s22   ;;  %s1402_s21 = sphi %s1515_s21, %s2259_s21   ;;  %s1398_s20 = sphi %s1513_s20, %s2258_s20   ;;  %s1394_s19 = sphi %s1511_s19, %s2245_s19   ;;  %s1390_s18 = sphi %s1509_s18, %s2244_s18   ;;  %s1386_s17 = sphi %s1507_s17, %s2254_s17   ;;  %s1382_s16 = sphi %s1505_s16, %s2252_s16   ;;  %s1378_s15 = sphi %s1503_s15, %s2243_s15  }
  0x19   : > { %2155 = sst [smem:[#allocation18_spill]] %s1382_s16  ;;  %p2123_p0 = scmp.eq.s32.totalorder %s1462_s10, 0 }
  0x1a   : > { %2156 = sst [smem:[#allocation19_spill]] %s1390_s18  ;;  %p2122_p1 = scmp.eq.s32.totalorder %s1612_s11, 0 }
  0x1b   : > { %2157 = sst [smem:[#allocation20_spill]] %s1394_s19  ;;  %p87_p2 = scmp.ne.s32.totalorder %s1422_s26, %s1418_s25 }
  0x1c   : > { %2158 = sst [smem:[#allocation21_spill]] %s1398_s20  ;;  %p93_p3 = scmp.ne.s32.totalorder %s1418_s25, %s1414_s24 }
  0x1d   : > { %2159 = sst [smem:[#allocation22_spill]] %s1418_s25  ;;  %p89_p5 = por %p87_p2, %p2123_p0 }
  0x1e   : > { %2160 = sst [smem:[#allocation23_spill]] %s1430_s28  ;;  %p1626_p6 = por %p93_p3, %p2122_p1 }
  0x1f   : > { %2161 = sst [smem:[#allocation24_spill]] %s1434_s29  ;;  %p2121_p7 = scmp.lt.s32.totalorder %s1462_s10, 8 }
  0x20   : > { %2162 = sst [smem:[#allocation25_spill]] %s1438_s30  ;;  %s219_s4 = sand.u32 1, %s1462_s10  }
  0x21   : > { %2163 = sst [smem:[#allocation26_spill]] %s1442_s5  ;;  %s221_s5 = sand.u32 1, %s1422_s26  }
  0x22   : > { %2164 = sst [smem:[#allocation27_spill]] %s1446_s6  ;;  %s731_s12 = sshll.u32 %s221_s5, 3 }
  0x23   : > { %2165 = sst [smem:[#allocation28_spill]] %s1458_s9  ;;  %s732_s6 = sshll.u32 %s1458_s9, 7 }
  0x24   : > { %s2166_s14 = scalar_select %p1626_p6, 1, 0 }
  0x25   : > { %s2168_s1 = sld [smem:[#allocation41_spill]]  ;;  %s223_s24 = scalar_lea.vmem [#allocation6], %s731_s12 }
  0x26   : > { %2167 = sst [smem:[#allocation29_spill]] %s2166_s14  ;;  %s230_s25 = sshll.u32 %s223_s24, 4  ;;  %s1639_s25 = int_to_ptr.vmem [resolvable:$true] %s230_s25 }
  0x27   : > { %p1643_p8 = pnand %p2121_p7, %p89_p5  ;;  %s1649_s3 = scalar_lea.sflag [#allocation7], %s219_s4 }
  0x28   : > { %2170 = sst [smem:[#allocation30_spill]] %s1649_s3 }
  0x29   : > { %p1122_p12 = pneg %p1643_p8 }
  0x2b   : > { %s1637_s13 = scalar_lea.hbm %s2168_s1, %s732_s6  ;;  %s1125_s12 = scalar_lea.hbm %s2168_s1, 256 }
  0x2c   : > { %s1120_s30 = scalar_lea.hbm %s1637_s13, 128  ;;  %p1126_p3 = scmp.lt.u32.totalorder %s1637_s13, %s2168_s1 }
  0x2d   : > { %p1121_p11 = scmp.ne.s32.totalorder %s1637_s13, %s1120_s30  ;;  %p1127_p5 = scmp.lt.u32.totalorder %s1125_s12, %s1120_s30 }
  0x2e   : > { %p1129_p4 = scmp.lt.u32.totalorder %s1120_s30, %s1637_s13 }
  0x2f   : > { %p1123_p13 = pnand %p1122_p12, %p1121_p11  ;;  %p1128_p7 = por %p1127_p5, %p1126_p3 }
  0x31   : > { %p1124_p2 = pneg %p1123_p13  ;;  %p1130_p1 = por %p1129_p4, %p1128_p7 }
  0x33   : > { %p1131_p0 = pnand %p1130_p1, %p1124_p2 }
  0x35   : > { %1134 = shalt.err (!%p1131_p0)
}
  0x36   : > { %s1135_s4 = scalar_lea.vmem %s1639_s25, 128  ;;  %s1464_s5 = smov [#allocation6]  }
  0x37   : > { %p1136_p11 = scmp.ne.s32.totalorder %s1639_s25, %s1135_s4  ;;  %s1140_s6 = sshll.u32 %s1464_s5, 4  ;;  %s1141_s6 = int_to_ptr.vmem [resolvable:$false] %s1140_s6 }
  0x38   : > { %s1142_s18 = scalar_lea.vmem %s1141_s6, 256  ;;  %p1143_p10 = scmp.lt.s32.totalorder %s1639_s25, %s1141_s6 }
  0x39   : > { %p1138_p13 = pnand %p1136_p11, %p1122_p12  ;;  %p1144_p3 = scmp.lt.s32.totalorder %s1142_s18, %s1135_s4 }
  0x3b   : > { %p1139_p9 = pneg %p1138_p13  ;;  %p1145_p5 = por %p1144_p3, %p1143_p10 }
  0x3d   : > { %p1146_p4 = pnand %p1145_p5, %p1139_p9 }
  0x3f   : > { %1149 = shalt.err (!%p1146_p4)
}
  0x40   : > { %922 = dma.hbm_to_vmem [thread:$0]  (!%p1643_p8), %s1637_s13, 128, %s1639_s25, %s1649_s3  }
  0x41   : > { %p2171_p0 = scmp.lt.s32.totalorder %s1462_s10, 9  ;;  %p2172_p1 = scmp.ge.s32.totalorder %s1462_s10, 1 }
  0x42   : > { %s725_s30 = sadd.s32 4294967294, %s1462_s10   ;;  %s38_s12 = sadd.s32 1, %s1450_s7 }
  0x43   : > { %p1681_p7 = pnand %p2172_p1, %p2171_p0  ;;  %p39_p9 = scmp.ge.s32.totalorder %s38_s12, 2 }
  0x44   : > { %s41_s24 = sadd.s32 1, %s1454_s8  ;;  %s54_s4 = sadd.s32 1, %s1434_s29 }
  0x45   : > { %s2173_s14 = scalar_select %p1681_p7, 1, 0 }
  0x46   : > { %p61_p10 = scmp.ne.s32.totalorder %s1434_s29, %s1430_s28  ;;  %s2272_s12 = smov (%p39_p9, %s38_s12), 0 }
  0x47   : > { %2174 = sst [smem:[#allocation31_spill]] %s2173_s14  ;;  %s2274_s24 = smov (!%p39_p9, %s41_s24), %s1454_s8 }
  0x48   : > { %2175 = sst [smem:[#allocation32_spill]] %s2272_s12  ;;  %s50_s25 = ssub.s32 %s1450_s7, %s2272_s12 }
  0x49   : > { %p2176_p8 = scmp.eq.s32.totalorder %s1462_s10, 0  ;;  %p43_p2 = scmp.ge.s32.totalorder %s2274_s24, 2 }
  0x4a   : > { %p67_p11 = scmp.ne.s32.totalorder %s1430_s28, %s1426_s27  ;;  %s162_s5 = sadd.s32 1, %s1386_s17 }
  0x4b   : > { %p1698_p12 = por %p2176_p8, %p61_p10  ;;  %p172_p13 = scmp.ne.s32.totalorder %s1386_s17, %s1382_s16 }
  0x4c   : > { %s2276_s24 = smov (%p43_p2, %s2274_s24), 0  ;;  %s2179_s6 = sadd.s32 1, %s1458_s9 }
  0x4d   : > { %2178 = sst [smem:[#allocation33_spill]] %s2276_s24  ;;  %s2278_s6 = smov (!%p43_p2, %s2179_s6), %s1458_s9 }
  0x4e   : > { %p2180_p3 = scmp.eq.s32.totalorder %s1612_s11, 0  ;;  %s1720_s1 = ssub.s32 %s1454_s8, %s2276_s24 }
  0x4f   : > { %p47_p4 = scmp.ge.s32.totalorder %s2278_s6, 2  ;;  %s131_s27 = sor.u32 %s1720_s1, %s50_s25 }
  0x50   : > { %p1714_p5 = por %p2180_p3, %p67_p11  ;;  %p2183_p1 = scmp.eq.s32.totalorder %s1612_s11, 7 }
  0x51   : > { %s2280_s6 = smov (%p47_p4, %s2278_s6), 0  ;;  %p1732_p10 = scmp.eq.s32.totalorder %s131_s27, 0 }
  0x52   : > { %s2181_s18 = scalar_select %p1714_p5, 1, 0 }
  0x53   : > { %p1726_p9 = por %p2183_p1, %p172_p13  ;;  %2186 = sst [smem:[#allocation36_spill]] %s2280_s6 }
  0x54   : > { %2182 = sst [smem:[#allocation34_spill]] %s2181_s18  ;;  %p178_p8 = scmp.ne.s32.totalorder %s1382_s16, %s1378_s15 }
  0x55   : > { %s2184_s12 = scalar_select %p1726_p9, 1, 0 }
  0x56   : > { %s2187_s24 = scalar_select %p1732_p10, 1, 0 }
  0x57   : > { %2185 = sst [smem:[#allocation35_spill]] %s2184_s12  ;;  %s49_s18 = ssub.s32 %s1458_s9, %s2280_s6 }
  0x58   : > { %2188 = sst [smem:[#allocation37_spill]] %s2187_s24  ;;  %p179_p2 = scmp.eq.s32.totalorder %s725_s30, 7 }
  0x59   : > { %s51_s28 = sor.u32 %s50_s25, %s49_s18  ;;  %p78_p11 = scmp.eq.s32.totalorder %s49_s18, 0 }
  0x5a   : > { %p52_p3 = scmp.eq.s32.totalorder %s51_s28, 0  ;;  %s159_s14 = sor.u32 %s1720_s1, %s49_s18 }
  0x5b   : > { %s2189_s19 = sadd.s32 1, %s1422_s26  ;;  %p160_p13 = scmp.eq.s32.totalorder %s159_s14, 0 }
  0x5c   : > { %s1744_s12 = scalar_select %p78_p11, %s1422_s26, %s2189_s19  }
  0x5d   : > { %s1747_s20 = scalar_select %p52_p3, %s1434_s29, %s54_s4  }
  0x5e   : > { %2190 = sst [smem:[#allocation38_spill]] %s1744_s12  ;;  %p1749_p4 = por %p179_p2, %p178_p8 }
  0x5f   : > { %2191 = sst [smem:[#allocation39_spill]] %s1747_s20  ;;  %s199_s15 = sand.u32 1, %s1434_s29  }
  0x60   : > { %s2192_s27 = scalar_select %p1749_p4, 1, 0 }
  0x61   : > { %s729_s6 = sshll.u32 %s1458_s9, 1  ;;  %s728_s25 = sshll.u32 %s199_s15, 3 }
  0x62   : > { %s1756_s30 = scalar_select %p160_p13, %s1386_s17, %s162_s5  }
  0x63   : > { %s208_s28 = sadd.s32 %s1450_s7, %s729_s6  ;;  %s203_s24 = scalar_lea.vmem [#allocation3], %s728_s25 }
  0x64   : > { %s730_s16 = sshll.u32 %s208_s28, 7  ;;  %s212_s18 = sshll.u32 %s203_s24, 4  ;;  %s1764_s18 = int_to_ptr.vmem [resolvable:$true] %s212_s18 }
  0x65   : > { %s2193_s0 = sld [smem:[#allocation40_spill]]  ;;  %p2194_p1 = scmp.lt.s32.totalorder %s1462_s10, 8 }
  0x66   : > { %s200_s4 = scalar_lea.sflag [#allocation4], %s199_s15 }
  0x67   : > { %p1770_p8 = pnand %p2194_p1, %p1698_p12 }
  0x69   : > { %p1152_p11 = pneg %p1770_p8 }
  0x6b   : > { %s1762_s19 = scalar_lea.hbm %s2193_s0, %s730_s16  ;;  %s1155_s3 = scalar_lea.hbm %s2193_s0, 512 }
  0x6c   : > { %s1150_s5 = scalar_lea.hbm %s1762_s19, 128  ;;  %p1156_p12 = scmp.lt.u32.totalorder %s1762_s19, %s2193_s0 }
  0x6d   : > { %p1151_p2 = scmp.ne.s32.totalorder %s1762_s19, %s1150_s5  ;;  %p1157_p1 = scmp.lt.u32.totalorder %s1155_s3, %s1150_s5 }
  0x6e   : > { %p1159_p4 = scmp.lt.u32.totalorder %s1150_s5, %s1762_s19 }
  0x6f   : > { %p1153_p3 = pnand %p1152_p11, %p1151_p2  ;;  %p1158_p0 = por %p1157_p1, %p1156_p12 }
  0x71   : > { %p1154_p13 = pneg %p1153_p3  ;;  %p1160_p9 = por %p1159_p4, %p1158_p0 }
  0x73   : > { %p1161_p6 = pnand %p1160_p9, %p1154_p13 }
  0x75   : > { %1164 = shalt.err (!%p1161_p6)
}
  0x76   : > { %s1165_s15 = scalar_lea.vmem %s1764_s18, 128  ;;  %s1465_s25 = smov [#allocation3]  }
  0x77   : > { %p1166_p2 = scmp.ne.s32.totalorder %s1764_s18, %s1165_s15  ;;  %s1170_s28 = sshll.u32 %s1465_s25, 4  ;;  %s1171_s28 = int_to_ptr.vmem [resolvable:$false] %s1170_s28 }
  0x78   : > { %s1172_s2 = scalar_lea.vmem %s1171_s28, 256  ;;  %p1173_p7 = scmp.lt.s32.totalorder %s1764_s18, %s1171_s28 }
  0x79   : > { %p1168_p3 = pnand %p1166_p2, %p1152_p11  ;;  %p1174_p12 = scmp.lt.s32.totalorder %s1172_s2, %s1165_s15 }
  0x7b   : > { %p1169_p5 = pneg %p1168_p3  ;;  %p1175_p1 = por %p1174_p12, %p1173_p7 }
  0x7d   : > { %p1176_p0 = pnand %p1175_p1, %p1169_p5 }
  0x7f   : > { %1179 = shalt.err (!%p1176_p0)
}
  0x80   : > { %919 = dma.hbm_to_vmem [thread:$0]  (!%p1770_p8), %s1762_s19, 128, %s1764_s18, %s200_s4  }
  0x81   : > { %s106_s5 = sadd.s32 1, %s1410_s23  ;;  %p2196_p6 = scmp.eq.s32.totalorder %s1720_s1, 0 }
  0x82   : > { %p113_p7 = scmp.ne.s32.totalorder %s1410_s23, %s1406_s22  ;;  %p119_p5 = scmp.ne.s32.totalorder %s1406_s22, %s1402_s21 }
  0x83   : > { %s1804_s16 = scalar_select %p2196_p6, %s1410_s23, %s106_s5  }
  0x84   : > { %s239_s14 = sand.u32 1, %s1410_s23   ;;  %s734_s3 = sshll.u32 %s1454_s8, 7 }
  0x85   : > { %p2197_p9 = scmp.eq.s32.totalorder %s1462_s10, 0  ;;  %p2198_p11 = scmp.eq.s32.totalorder %s1612_s11, 0 }
  0x86   : > { %s733_s6 = sshll.u32 %s239_s14, 7  ;;  %s2200_s28 = sld [smem:[#allocation42_spill]] }
  0x87   : > { %p115_p4 = por %p113_p7, %p2197_p9  ;;  %p1816_p13 = por %p119_p5, %p2198_p11 }
  0x88   : > { %p2202_p8 = scmp.lt.s32.totalorder %s1462_s10, 8  ;;  %s241_s21 = scalar_lea.vmem [#allocation8], %s733_s6 }
  0x89   : > { %s2199_s13 = scalar_select %p1816_p13, 1, 0 }
  0x8a   : > { %p1827_p2 = pnand %p2202_p8, %p115_p4  ;;  %s247_s19 = sshll.u32 %s241_s21, 4  ;;  %s1831_s19 = int_to_ptr.vmem [resolvable:$true] %s247_s19 }
  0x8c   : > { %s2201_s2 = smov %s2200_s28  ;;  %s1823_s18 = scalar_lea.hbm %s2200_s28, %s734_s3 }
  0x8d   : > { %s1180_s4 = scalar_lea.hbm %s1823_s18, 2048  ;;  %p1182_p12 = pneg %p1827_p2 }
  0x8e   : > { %p1181_p3 = scmp.ne.s32.totalorder %s1823_s18, %s1180_s4  ;;  %s1185_s3 = scalar_lea.hbm %s2201_s2, 4096 }
  0x8f   : > { %p1186_p6 = scmp.lt.u32.totalorder %s1823_s18, %s2201_s2  ;;  %p1187_p7 = scmp.lt.u32.totalorder %s1185_s3, %s1180_s4 }
  0x90   : > { %p1183_p1 = pnand %p1182_p12, %p1181_p3  ;;  %p1189_p9 = scmp.lt.u32.totalorder %s1180_s4, %s1823_s18 }
  0x91   : > { %p1188_p5 = por %p1187_p7, %p1186_p6 }
  0x92   : > { %p1184_p0 = pneg %p1183_p1 }
  0x93   : > { %p1190_p4 = por %p1189_p9, %p1188_p5 }
  0x95   : > { %p1191_p11 = pnand %p1190_p4, %p1184_p0 }
  0x97   : > { %1194 = shalt.err (!%p1191_p11)
}
  0x98   : > { %s1195_s6 = scalar_lea.vmem %s1831_s19, 2048  ;;  %s1466_s28 = smov [#allocation8]  }
  0x99   : > { %p1196_p8 = scmp.ne.s32.totalorder %s1831_s19, %s1195_s6  ;;  %s1200_s21 = sshll.u32 %s1466_s28, 4  ;;  %s1201_s21 = int_to_ptr.vmem [resolvable:$false] %s1200_s21 }
  0x9a   : > { %s1202_s5 = scalar_lea.vmem %s1201_s21, 4096  ;;  %p1203_p13 = scmp.lt.s32.totalorder %s1831_s19, %s1201_s21 }
  0x9b   : > { %p1198_p3 = pnand %p1196_p8, %p1182_p12  ;;  %p1204_p6 = scmp.lt.s32.totalorder %s1202_s5, %s1195_s6 }
  0x9d   : > { %p1199_p1 = pneg %p1198_p3  ;;  %p1205_p7 = por %p1204_p6, %p1203_p13 }
  0x9f   : > { %p1206_p5 = pnand %p1205_p7, %p1199_p1 }
  0xa1   : > { %1209 = shalt.err (!%p1206_p5)
}
  0xa2   : > { %s2148_s4 = smov 256   ;;  %s2204_s14 = sld [smem:[#allocation30_spill]] }
  0xa3   : > { %s2205_s3 = sld [smem:[#allocation21_spill]]  ;;  %s2206_s15 = sld [smem:[#allocation20_spill]] }
  0xa4   : > { %s2208_s24 = sld [smem:[#allocation19_spill]]  ;;  %s1468_s6 = smov 128  }
  0xa5   : > { %s1469_s28 = smov 8   ;;  %p2209_p12 = scmp.eq.s32.totalorder %s1462_s10, 0 }
  0xa6   : > { %s2210_s2 = sshll.u32 %s1450_s7, 5  ;;  %p2211_p4 = scmp.eq.s32.totalorder %s1612_s11, 0 }
  0xa7   : > { %s267_s9 = sadd.s32 %s1454_s8, %s2210_s2 }
  0xa8   : > { %925 = dma.hbm_to_vmem [thread:$0]  (!%p1827_p2), %s1823_s18, 2048, %s1831_s19, %s2204_s14, %s2148_s4, %s1468_s6, %s1469_s28  }
  0xa9   : > { %s134_s21 = sadd.s32 1, %s2205_s3  ;;  %p141_p13 = scmp.ne.s32.totalorder %s2205_s3, %s2206_s15 }
  0xaa   : > { %s1868_s5 = scalar_select %p1732_p10, %s2205_s3, %s134_s21  }
  0xab   : > { %p143_p0 = por %p141_p13, %p2209_p12  ;;  %p147_p9 = scmp.ne.s32.totalorder %s2206_s15, %s2208_s24 }
  0xac   : > { %s257_s0 = sand.u32 1, %s2205_s3   ;;  %s738_s29 = sshll.u32 %s267_s9, 7 }
  0xad   : > { %p1880_p11 = por %p147_p9, %p2211_p4  ;;  %s735_s1 = sshll.u32 %s257_s0, 7 }
  0xae   : > { %s2213_s19 = sld [smem:[#allocation43_spill]]  ;;  %s261_s24 = scalar_lea.vmem [#allocation9], %s735_s1 }
  0xaf   : > { %s270_s3 = sshll.u32 %s261_s24, 4  ;;  %p2215_p10 = scmp.lt.s32.totalorder %s1462_s10, 8  ;;  %s1895_s3 = int_to_ptr.vmem [resolvable:$true] %s270_s3 }
  0xb0   : > { %s1897_s9 = scalar_lea.sflag [#allocation10], %s257_s0 }
  0xb1   : > { %p1891_p2 = pnand %p2215_p10, %p143_p0 }
  0xb3   : > { %p1212_p3 = pneg %p1891_p2 }
  0xb4   : > { %s2214_s14 = smov %s2213_s19  ;;  %s1887_s4 = scalar_lea.hbm %s2213_s19, %s738_s29 }
  0xb5   : > { %s1210_s12 = scalar_lea.hbm %s1887_s4, 2048  ;;  %s1215_s25 = scalar_lea.hbm %s2214_s14, 8192 }
  0xb6   : > { %p1211_p8 = scmp.ne.s32.totalorder %s1887_s4, %s1210_s12  ;;  %p1216_p7 = scmp.lt.u32.totalorder %s1887_s4, %s2214_s14 }
  0xb7   : > { %p1217_p5 = scmp.lt.u32.totalorder %s1215_s25, %s1210_s12  ;;  %p1219_p12 = scmp.lt.u32.totalorder %s1210_s12, %s1887_s4 }
  0xb8   : > { %p1213_p1 = pnand %p1212_p3, %p1211_p8 }
  0xb9   : > { %p1218_p13 = por %p1217_p5, %p1216_p7 }
  0xba   : > { %p1214_p6 = pneg %p1213_p1 }
  0xbb   : > { %p1220_p0 = por %p1219_p12, %p1218_p13 }
  0xbd   : > { %p1221_p9 = pnand %p1220_p0, %p1214_p6 }
  0xbf   : > { %1224 = shalt.err (!%p1221_p9)
}
  0xc0   : > { %s1225_s0 = scalar_lea.vmem %s1895_s3, 2048  ;;  %s1470_s18 = smov [#allocation9]  }
  0xc1   : > { %p1226_p4 = scmp.ne.s32.totalorder %s1895_s3, %s1225_s0  ;;  %s1230_s19 = sshll.u32 %s1470_s18, 4  ;;  %s1231_s19 = int_to_ptr.vmem [resolvable:$false] %s1230_s19 }
  0xc2   : > { %s1232_s24 = scalar_lea.vmem %s1231_s19, 4096  ;;  %p1233_p1 = scmp.lt.s32.totalorder %s1895_s3, %s1231_s19 }
  0xc3   : > { %p1228_p10 = pnand %p1226_p4, %p1212_p3  ;;  %p1234_p7 = scmp.lt.s32.totalorder %s1232_s24, %s1225_s0 }
  0xc5   : > { %p1229_p8 = pneg %p1228_p10  ;;  %p1235_p5 = por %p1234_p7, %p1233_p1 }
  0xc7   : > { %p1236_p13 = pnand %p1235_p5, %p1229_p8 }
  0xc9   : > { %1239 = shalt.err (!%p1236_p13)
}
  0xca   : > { %s2217_s12 = smov 256   ;;  %s2218_s29 = sld [smem:[#allocation31_spill]] }
  0xcb   : > { %928 = dma.hbm_to_vmem [thread:$0]  (!%p1891_p2), %s1887_s4, 2048, %s1895_s3, %s1897_s9, %s2217_s12, %s1468_s6, %s1469_s28  }
  0xd0   : > { %p2219_p3 = scmp.ne.s32.totalorder %s2218_s29, 0 }
  0xd1   : > { %s2220_s15 = sld [smem:[#allocation23_spill]] (!%p2219_p3) }
  0xd2   : > { %282 = sbr.rel (%p2219_p3) target bundleno = 791 (0x317), region = 36  ;;  %s2221_s25 = sld [smem:[#allocation34_spill]] (!%p2219_p3) }
  0xd7   : > { %s284_s21 = sand.u32 (!%p2219_p3), 1, %s2220_s15  }
  0xd8   : > { %s1931_s1 = sshll.u32 (!%p2219_p3), %s284_s21, 3  ;;  %s285_s0 = scalar_lea.sflag (!%p2219_p3), [#allocation4], %s284_s21 }
  0xd9   : > { %s288_s18 = scalar_lea.vmem [#allocation3], %s1931_s1  ;;  %p2222_p6 = scmp.ne.s32.totalorder %s2221_s25, 0 }
  0xdb   : > { %1357 = dma.done.wait (%p2222_p6), %s285_s0, 128  }
  0xdc   : > { %1359 = vsyncadd (%p2222_p6), %s285_s0, 4294967168  ;;  %s2223_s2 = sld [smem:[#allocation22_spill]]  ;;  %s2224_s19 = sld [smem:[#allocation29_spill]] }
  0xdd   : > { %s293_s4 = sand.u32 1, %s1612_s11  }
  0xde   : > { %s294_s3 = scalar_lea.sflag [#allocation7], %s293_s4 }
  0xe2   : > { %s295_s6 = sand.u32 1, %s2223_s2   ;;  %p2225_p2 = scmp.ne.s32.totalorder %s2224_s19, 0 }
  0xe3   : > { %s1940_s28 = sshll.u32 %s295_s6, 3 }
  0xe4   : > { %s297_s9 = scalar_lea.vmem [#allocation6], %s1940_s28 }
  0xe5   : > { %1361 = dma.done.wait (%p2225_p2), %s294_s3, 128  }
  0xe6   : > { %1363 = vsyncadd (%p2225_p2), %s294_s3, 4294967168  ;;  %s304_s24 = sand.u32 1, %s1406_s22   ;;  %p2226_p12 = scmp.ne.s32.totalorder %s2199_s13, 0 }
  0xe7   : > { %s742_s12 = sshll.u32 %s304_s24, 7 }
  0xe8   : > { %s1948_s29 = scalar_lea.vmem [#allocation8], %s742_s12 }
  0xe9   : > { %1365 = dma.done.wait (%p2226_p12), %s294_s3, 2048  }
  0xea   : > { %1367 = vsyncadd (%p2226_p12), %s294_s3, 4294965248  ;;  %s2227_s11 = sld [smem:[#allocation20_spill]] }
  0xf0   : > { %s311_s15 = sand.u32 1, %s2227_s11  }
  0xf1   : > { %s743_s25 = sshll.u32 %s311_s15, 7  ;;  %s312_s21 = scalar_lea.sflag [#allocation10], %s311_s15 }
  0xf2   : > { %s1955_s0 = scalar_lea.vmem [#allocation9], %s743_s25 }
  0xf3   : > { %1369 = dma.done.wait (%p1880_p11), %s312_s21, 2048  }
  0xf4   : > { %1371 = vsyncadd (%p1880_p11), %s312_s21, 4294965248  ;;  %s2228_s2 = sld [smem:[#allocation18_spill]]  ;;  %v1471_v0 = vmov 0.0|0.0   ;;  %vm1472_vm0 = vmmov 0   ;;  %v1473_v1 = vmov 0.0   ;;  %v357_v2 = vld [vmem:[%s1955_s0] sm:$0xff] }
  0xf5   : > { %858 = vmatprep.subr.bf16.mxu0 %v1471_v0  ;;  %820 = vmatprep.mubr.msk.f32.mxu0 %vm1472_vm0, %v1473_v1  ;;  %v358_v3 = vld [vmem:[%s1955_s0 + $0x8] sm:$0xff]  ;;  %v359_v4 = vld [vmem:[%s1955_s0 + $0x10] sm:$0xff]  ;;  %v360_v6 = vld [vmem:[%s1955_s0 + $0x18] sm:$0xff]  ;;  %s2229_s4 = sld [smem:[#allocation25_spill]] }
  0xf6   : > { %v859_v5 = vpack.c.bf16 %v358_v3, %v357_v2  ;;  %v862_v7 = vpack.c.bf16 %v360_v6, %v359_v4  ;;  %v361_v8 = vld [vmem:[%s1955_s0 + $0x20] sm:$0xff]  ;;  %v362_v9 = vld [vmem:[%s1955_s0 + $0x28] sm:$0xff]  ;;  %v363_v11 = vld [vmem:[%s1955_s0 + $0x30] sm:$0xff] }
  0xf7   : > { %v865_v10 = vpack.c.bf16 %v362_v9, %v361_v8  ;;  %v364_v12 = vld [vmem:[%s1955_s0 + $0x38] sm:$0xff]  ;;  %v365_v14 = vld [vmem:[%s1955_s0 + $0x40] sm:$0xff]  ;;  %v366_v15 = vld [vmem:[%s1955_s0 + $0x48] sm:$0xff] }
  0xf8   : > { %860 = vmatpush3.bf16.msra.mxu0 %v859_v5  ;;  %v868_v13 = vpack.c.bf16 %v364_v12, %v363_v11  ;;  %v871_v16 = vpack.c.bf16 %v366_v15, %v365_v14  ;;  %v367_v17 = vld [vmem:[%s1955_s0 + $0x50] sm:$0xff]  ;;  %v368_v18 = vld [vmem:[%s1955_s0 + $0x58] sm:$0xff]  ;;  %v369_v20 = vld [vmem:[%s1955_s0 + $0x60] sm:$0xff] }
  0xf9   : > { %861 = vmatprep.subr.bf16.mxu0 %v1471_v0  ;;  %v874_v19 = vpack.c.bf16 %v368_v18, %v367_v17  ;;  %v370_v21 = vld [vmem:[%s1955_s0 + $0x68] sm:$0xff]  ;;  %v371_v23 = vld [vmem:[%s1955_s0 + $0x70] sm:$0xff]  ;;  %v372_v24 = vld [vmem:[%s1955_s0 + $0x78] sm:$0xff] }
  0xfa   : > { %s352_s13 = sand.u32 1, %s2228_s2   ;;  %v877_v22 = vpack.c.bf16 %v370_v21, %v369_v20  ;;  %v880_v25 = vpack.c.bf16 %v372_v24, %v371_v23  ;;  %v356_v26 = vld [vmem:[%s288_s18] sm:$0xff] }
  0xfb   : > { %s1964_s19 = sshll.u32 %s352_s13, 3  ;;  %p745_p11 = scmp.ne.s32.totalorder %s2229_s4, 0 }
  0xfc   : > { %863 = vmatpush3.bf16.msra.mxu0 %v862_v7  ;;  %s354_s20 = scalar_lea.vmem [#allocation11], %s1964_s19 }
  0xfd   : > { %864 = vmatprep.subr.bf16.mxu0 %v1471_v0 }
 0x100   : > { %866 = vmatpush3.bf16.msra.mxu0 %v865_v10 }
 0x101   : > { %867 = vmatprep.subr.bf16.mxu0 %v1471_v0 }
 0x104   : > { %869 = vmatpush3.bf16.msra.mxu0 %v868_v13 }
 0x105   : > { %870 = vmatprep.subr.bf16.mxu0 %v1471_v0 }
 0x108   : > { %872 = vmatpush3.bf16.msra.mxu0 %v871_v16 }
 0x109   : > { %873 = vmatprep.subr.bf16.mxu0 %v1471_v0 }
 0x10c   : > { %875 = vmatpush3.bf16.msra.mxu0 %v874_v19 }
 0x10d   : > { %876 = vmatprep.subr.bf16.mxu0 %v1471_v0 }
 0x110   : > { %878 = vmatpush3.bf16.msra.mxu0 %v877_v22 }
 0x111   : > { %879 = vmatprep.subr.bf16.mxu0 %v1471_v0 }
 0x114   : > { %881 = vmatpush3.bf16.msra.mxu0 %v880_v25 }
 0x117   : > { %821 = vmatmul.mubr.f32.vlgmr.msra.gmra.mrb[0].mxu0 %v356_v26 }
 0x1e5   : > { %446 = sbr.rel (%p745_p11) target bundleno = 492 (0x1ec), region = 56 }
 0x1ea   : > { %v439_v27 = vpop.f32.mrb[0].mxu0 }
 0x1eb   : > { %v822_v28 = vpop.f32.mrb[1].mxu0  ;;  %447 = vst [vmem:[#allocation2] sm:$0xff] (!%p745_p11), %v439_v27 }
 0x1ec PF: > { %s2230_s6 = sld [smem:[#allocation25_spill]] }
 0x1f2   : > { %p746_p0 = scmp.le.s32.totalorder %s2230_s6, 0 }
 0x1f3   : > { %v452_v29 = vld [vmem:[#allocation2] sm:$0xff] (!%p746_p0) }
 0x1f4   : > { %451 = sbr.rel (%p746_p0) target bundleno = 507 (0x1fb), region = 60  ;;  %v453_v30 = vadd.f32 (!%p746_p0), %v452_v29, %v439_v27 }
 0x1f6   : > { %454 = vst [vmem:[#allocation2] sm:$0xff] (!%p746_p0), %v453_v30 }
 0x1fb PF: > { %s2231_s3 = sld [smem:[#allocation25_spill]] }
 0x201   : > { %p747_p9 = scmp.ne.s32.totalorder %s2231_s3, 1 }
 0x202   : > { %v461_v31 = vld [vmem:[%s1948_s29] sm:$0xff] (!%p747_p9)  ;;  %v462_v32 = vld [vmem:[%s1948_s29 + $0x8] sm:$0xff] (!%p747_p9)  ;;  %v463_v33 = vld [vmem:[%s1948_s29 + $0x10] sm:$0xff] (!%p747_p9)  ;;  %v1474_v34 = vmov (!%p747_p9), 0.0|0.0   ;;  %vm1475_vm1 = vmmov (!%p747_p9), 0   ;;  %v1476_v37 = vmov (!%p747_p9), 0.0  }
 0x203   : > { %458 = sbr.rel (%p747_p9) target bundleno = 763 (0x2fb), region = 64  ;;  %882 = vmatprep.subr.bf16.mxu0 (!%p747_p9), %v1474_v34  ;;  %v883_v35 = vpack.c.bf16 (!%p747_p9), %v462_v32, %v461_v31  ;;  %v464_v36 = vld [vmem:[%s1948_s29 + $0x18] sm:$0xff] (!%p747_p9)  ;;  %855 = vmatprep.mubr.msk.f32.mxu0 (!%p747_p9), %vm1475_vm1, %v1476_v37  ;;  %v465_v39 = vld [vmem:[%s1948_s29 + $0x20] sm:$0xff] (!%p747_p9)  ;;  %v466_v40 = vld [vmem:[%s1948_s29 + $0x28] sm:$0xff] (!%p747_p9) }
 0x204   : > { %v886_v38 = vpack.c.bf16 (!%p747_p9), %v464_v36, %v463_v33  ;;  %v889_v41 = vpack.c.bf16 (!%p747_p9), %v466_v40, %v465_v39  ;;  %v467_v42 = vld [vmem:[%s1948_s29 + $0x30] sm:$0xff] (!%p747_p9)  ;;  %v468_v43 = vld [vmem:[%s1948_s29 + $0x38] sm:$0xff] (!%p747_p9)  ;;  %v469_v45 = vld [vmem:[%s1948_s29 + $0x40] sm:$0xff] (!%p747_p9) }
 0x205   : > { %884 = vmatpush3.bf16.msra.mxu0 (!%p747_p9), %v883_v35  ;;  %v892_v44 = vpack.c.bf16 (!%p747_p9), %v468_v43, %v467_v42  ;;  %v470_v46 = vld [vmem:[%s1948_s29 + $0x48] sm:$0xff] (!%p747_p9)  ;;  %v471_v48 = vld [vmem:[%s1948_s29 + $0x50] sm:$0xff] (!%p747_p9)  ;;  %v472_v49 = vld [vmem:[%s1948_s29 + $0x58] sm:$0xff] (!%p747_p9) }
 0x206   : > { %885 = vmatprep.subr.bf16.mxu0 (!%p747_p9), %v1474_v34  ;;  %v895_v47 = vpack.c.bf16 (!%p747_p9), %v470_v46, %v469_v45  ;;  %v898_v50 = vpack.c.bf16 (!%p747_p9), %v472_v49, %v471_v48  ;;  %v473_v51 = vld [vmem:[%s1948_s29 + $0x60] sm:$0xff] (!%p747_p9)  ;;  %v474_v52 = vld [vmem:[%s1948_s29 + $0x68] sm:$0xff] (!%p747_p9)  ;;  %v475_v54 = vld [vmem:[%s1948_s29 + $0x70] sm:$0xff] (!%p747_p9) }
 0x207   : > { %v901_v53 = vpack.c.bf16 (!%p747_p9), %v474_v52, %v473_v51  ;;  %v476_v55 = vld [vmem:[%s1948_s29 + $0x78] sm:$0xff] (!%p747_p9) }
 0x208   : > { %v904_v56 = vpack.c.bf16 (!%p747_p9), %v476_v55, %v475_v54  ;;  %v460_v57 = vld [vmem:[%s297_s9] sm:$0xff] (!%p747_p9) }
 0x209   : > { %887 = vmatpush3.bf16.msra.mxu0 (!%p747_p9), %v886_v38  ;;  %v459_v58 = vld [vmem:[#allocation2] sm:$0xff] (!%p747_p9) }
 0x20a   : > { %888 = vmatprep.subr.bf16.mxu0 %v1474_v34 }
 0x20d   : > { %890 = vmatpush3.bf16.msra.mxu0 %v889_v41 }
 0x20e   : > { %891 = vmatprep.subr.bf16.mxu0 %v1474_v34 }
 0x211   : > { %893 = vmatpush3.bf16.msra.mxu0 %v892_v44 }
 0x212   : > { %894 = vmatprep.subr.bf16.mxu0 %v1474_v34 }
 0x215   : > { %896 = vmatpush3.bf16.msra.mxu0 %v895_v47 }
 0x216   : > { %897 = vmatprep.subr.bf16.mxu0 %v1474_v34 }
 0x219   : > { %899 = vmatpush3.bf16.msra.mxu0 %v898_v50 }
 0x21a   : > { %900 = vmatprep.subr.bf16.mxu0 %v1474_v34 }
 0x21d   : > { %902 = vmatpush3.bf16.msra.mxu0 %v901_v53 }
 0x21e   : > { %903 = vmatprep.subr.bf16.mxu0 %v1474_v34 }
 0x221   : > { %905 = vmatpush3.bf16.msra.mxu0 %v904_v56 }
 0x224   : > { %856 = vmatmul.mubr.f32.vlgmr.msra.gmra.mrb[0].mxu0 %v460_v57 }
 0x2f7   : > { %v543_v59 = vpop.f32.mrb[0].mxu0 }
 0x2f8   : > { %v547_v60 = vadd.f32 %v543_v59, %v459_v58  ;;  %v857_v61 = vpop.f32.mrb[1].mxu0 }
 0x2fa   : > { %548 = vst [vmem:[%s354_s20] sm:$0xff] %v547_v60 }
 0x2fb PF: > { %s2232_s1 = sld [smem:[#allocation27_spill]]  ;;  %s2233_s18 = sld [smem:[#allocation26_spill]] }
 0x2fc   : > { %s2235_s12 = sld [smem:[#allocation35_spill]]  ;;  %s565_s15 = sshll.u32 %s354_s20, 4  ;;  %s2012_s15 = int_to_ptr.vmem [resolvable:$true] %s565_s15 }
 0x2fd   : > { %s2236_s21 = sld [smem:[#allocation44_spill]]  ;;  %s550_s4 = scalar_lea.sflag [#allocation5], %s352_s13 }
 0x2fe   : > { %s1240_s6 = scalar_lea.vmem %s2012_s15, 128  ;;  %s1477_s3 = smov [#allocation11]  }
 0x2ff   : > { %p1241_p4 = scmp.ne.s32.totalorder %s2012_s15, %s1240_s6  ;;  %s1244_s19 = sshll.u32 %s1477_s3, 4  ;;  %s1245_s19 = int_to_ptr.vmem [resolvable:$false] %s1244_s19 }
 0x300   : > { %s1246_s20 = scalar_lea.vmem %s1245_s19, 256  ;;  %p1247_p7 = scmp.lt.s32.totalorder %s2012_s15, %s1245_s19 }
 0x301   : > { %s749_s29 = sshll.u32 %s2232_s1, 1  ;;  %p1248_p5 = scmp.lt.s32.totalorder %s1246_s20, %s1240_s6 }
 0x302   : > { %s561_s11 = sadd.s32 %s2233_s18, %s749_s29  ;;  %p2238_p10 = scmp.ne.s32.totalorder %s2235_s12, 0 }
 0x303   : > { %s750_s25 = sshll.u32 %s561_s11, 7  ;;  %s2237_s0 = smov %s2236_s21 }
 0x304   : > { %s563_s2 = scalar_lea.hbm %s2236_s21, %s750_s25  ;;  %p1242_p8 = pnand %p1241_p4, %p2238_p10 }
 0x305   : > { %p1249_p13 = por %p1248_p5, %p1247_p7 }
 0x306   : > { %p1243_p1 = pneg %p1242_p8 }
 0x308   : > { %p1250_p3 = pnand %p1249_p13, %p1243_p1 }
 0x30a   : > { %1253 = shalt.err (!%p1250_p3)
}
 0x30b   : > { %s1254_s1 = scalar_lea.hbm %s563_s2, 128  ;;  %s1258_s24 = scalar_lea.hbm %s2237_s0, 512 }
 0x30c   : > { %p1255_p6 = scmp.ne.s32.totalorder %s563_s2, %s1254_s1  ;;  %p1259_p11 = scmp.lt.u32.totalorder %s563_s2, %s2237_s0 }
 0x30d   : > { %p1260_p0 = scmp.lt.u32.totalorder %s1258_s24, %s1254_s1  ;;  %p1262_p4 = scmp.lt.u32.totalorder %s1254_s1, %s563_s2 }
 0x30e   : > { %p1256_p2 = pnand %p1255_p6, %p2238_p10 }
 0x30f   : > { %p1261_p9 = por %p1260_p0, %p1259_p11 }
 0x310   : > { %p1257_p12 = pneg %p1256_p2 }
 0x311   : > { %p1263_p8 = por %p1262_p4, %p1261_p9 }
 0x313   : > { %p1264_p1 = pnand %p1263_p8, %p1257_p12 }
 0x315   : > { %1267 = shalt.err (!%p1264_p1)
}
 0x316   : > { %914 = dma.vmem_to_hbm [thread:$0]  (%p2238_p10), %s2012_s15, 128, %s563_s2, %s550_s4  }
 0x317 PF: > { %s2239_s25 = sld [smem:[#allocation17_spill]]  ;;  %p934_p7 = scmp.ge.s32.totalorder %s1462_s10, 2 }
 0x318   : > { %p2240_p5 = scmp.ne.s32.totalorder %s2192_s27, 0 }
 0x31a   : > { %p930_p13 = pnand %p934_p7, %p2240_p5 }
 0x31d   : > { %s577_s28 = sand.u32 1, %s2239_s25  }
 0x31e   : > { %s578_s9 = scalar_lea.sflag [#allocation5], %s577_s28 }
 0x31f   : > { %1373 = dma.done.wait (!%p930_p13), %s578_s9, 128  }
 0x320   : > { %1375 = vsyncadd (!%p930_p13), %s578_s9, 4294967168  ;;  %s26_s10 = sadd.s32 1, %s1462_s10   ;;  %s2243_s15 = sld [smem:[#allocation18_spill]] }
 0x321   : > { %p2040_p3 = scmp.ge.s32.totalorder %s26_s10, 10   ;;  %s2244_s18 = sld [smem:[#allocation20_spill]] }
 0x322   : > { %s2245_s19 = sld [smem:[#allocation21_spill]]  ;;  %s2246_s12 = smov %s1804_s16 }
 0x323   : > { %s2247_s24 = sld [smem:[#allocation22_spill]]  ;;  %s2248_s27 = sld [smem:[#allocation38_spill]] }
 0x324   : > { %s2249_s2 = sld [smem:[#allocation23_spill]]  ;;  %s2250_s28 = sld [smem:[#allocation24_spill]] }
 0x325   : > { %s2251_s29 = sld [smem:[#allocation39_spill]]  ;;  %s2252_s16 = smov %s1386_s17 }
 0x326   : > { %s2253_s4 = sld [smem:[#allocation28_spill]]  ;;  %s2254_s17 = smov %s1756_s30 }
 0x327   : > { %s2255_s3 = sld [smem:[#allocation32_spill]]  ;;  %s2256_s1 = sld [smem:[#allocation33_spill]] }
 0x328   : > { %s2257_s9 = sld [smem:[#allocation36_spill]]  ;;  %s2258_s20 = smov %s1868_s5 }
 0x329   : > { %s2259_s21 = smov %s1406_s22  ;;  %s2261_s22 = smov %s1410_s23 }
 0x32a   : > { %s2262_s23 = smov %s2246_s12  ;;  %s2263_s25 = smov %s1422_s26 }
 0x32b   : > { %s2264_s26 = smov %s2248_s27  ;;  %s2265_s27 = smov %s2249_s2 }
 0x32c   : > { %s2266_s30 = smov %s1450_s7  ;;  %s2267_s5 = smov %s1454_s8 }
 0x32d   : > { %s2268_s6 = smov %s2253_s4  ;;  %s2269_s7 = smov %s2255_s3 }
 0x32e   : > { %s2270_s8 = smov %s2256_s1  ;;  %25 = sbr.rel (!%p2040_p3) target bundleno = 24 (0x18), region = 130 }
 0x335   :  { %583 = vsyncpa [#allocation4], 1 }
 0x336   :  { %585 = vsyncpa [#allocation4 + $0x1], 1 }
 0x337   :  { %586 = vsyncpa [#allocation7], 1 }
 0x338   :  { %588 = vsyncpa [#allocation7 + $0x1], 1 }
 0x339   :  { %589 = vsyncpa [#allocation10], 1 }
 0x33a   :  { %591 = vsyncpa [#allocation10 + $0x1], 1 }
 0x33b   :  { %592 = vsyncpa [#allocation5], 1 }
 0x33c   :  { %594 = vsyncpa [#allocation5 + $0x1], 1 }

</bundles_post_ra>
